<compile_context>
chip_gen: v6e
topology: v6e:2x2x1
jax: 0.10.0
libtpu: 0.0.40
codegen_flags: <defaults>
</compile_context>

<pallas_src>
import jax
import jax.numpy as jnp
from jax.experimental import pallas as pl
from jax.experimental.pallas import tpu as pltpu


def mlp_kernel(x_ref, w1_ref, b1_ref, w2_ref, b2_ref, w3_ref, b3_ref, o_ref):
    # In-kernel cast (rides the idle VPU; a no-op when x and weights are f32).
    x = x_ref[...].astype(w1_ref.dtype)                      # (TB, d_in)
    # Layer 1: linear + relu (MXU matmul, f32 accumulate).
    h = jnp.dot(x, w1_ref[...], preferred_element_type=jnp.float32) + b1_ref[...]
    h = jnp.maximum(h, 0.0)
    # Layer 2: linear + relu.
    h = jnp.dot(h.astype(w2_ref.dtype), w2_ref[...],
                preferred_element_type=jnp.float32) + b2_ref[...]
    h = jnp.maximum(h, 0.0)
    # Layer 3 (last layer): linear only, no activation (matches forward()).
    out = jnp.dot(h.astype(w3_ref.dtype), w3_ref[...],
                  preferred_element_type=jnp.float32) + b3_ref[...]
    o_ref[...] = out.astype(o_ref.dtype)


def _round_up(x, m):
    return ((x + m - 1) // m) * m


def _largest_divisor_tile(b, cap):
    """Largest t <= cap with t % 8 == 0 and b % t == 0 (requires b % 8 == 0)."""
    n8 = b // 8
    best = 0
    d = 1
    while d * d <= n8:
        if n8 % d == 0:
            for q in (d, n8 // d):
                t = 8 * q
                if t <= cap and t > best:
                    best = t
        d += 1
    return best


def _choose_batch_tile(b, block_b):
    """Pick (tile, padded_batch).

    Prefers a tile that divides b exactly (no padding pass over x), is a
    multiple of 8 sublanes, is as large as possible up to block_b, and leaves
    >= 2 grid steps when b allows (so v7x megacore sharding has work for both
    TensorCores).
    """
    cap = max(8, min(block_b, _round_up(pl.cdiv(b, 2), 8)))
    if b % 8 == 0:
        t = _largest_divisor_tile(b, cap)
        # Accept the divisor unless it is pathologically small (>8x more grid
        # steps than the cap would give); otherwise fall back to padding.
        if t > 0 and t * 8 >= min(cap, b):
            return t, b
    tb = min(cap, _round_up(b, 8))
    return tb, _round_up(b, tb)


def neural_net_forward(x, params, *, block_b=8192, out_dtype=None):
    """params = ((w1, b1), (w2, b2), (w3, b3)) with w_i: (in, out), b_i: (1, out)."""
    (w1, b1), (w2, b2), (w3, b3) = params
    B, d_in = x.shape
    d_h1 = w1.shape[1]
    d_h2 = w2.shape[1]
    d_out = w3.shape[1]
    out_dtype = x.dtype if out_dtype is None else out_dtype

    tb, b_pad = _choose_batch_tile(B, block_b)
    xk = x
    if b_pad != B:
        # Rare fallback (ragged batch with no usable divisor): costs one extra
        # pass over x; padded rows are garbage but sliced off below.
        xk = jnp.pad(x, ((0, b_pad - B), (0, 0)))
    grid = (b_pad // tb,)

    resident = lambda i: (0, 0)  # same block every step -> DMA once, stays VMEM-resident

    elt = lambda a: a.size * a.dtype.itemsize
    cost = pl.CostEstimate(
        flops=2 * b_pad * (d_in * d_h1 + d_h1 * d_h2 + d_h2 * d_out),
        transcendentals=0,
        bytes_accessed=(elt(xk)
                        + b_pad * d_out * jnp.dtype(out_dtype).itemsize
                        + sum(elt(a) for a in (w1, b1, w2, b2, w3, b3))),
    )

    out = pl.pallas_call(
        mlp_kernel,
        out_shape=jax.ShapeDtypeStruct((b_pad, d_out), out_dtype),
        grid=grid,
        in_specs=[
            pl.BlockSpec((tb, d_in), lambda i: (i, 0)),    # x: streamed per batch tile
            pl.BlockSpec((d_in, d_h1), resident),           # w1
            pl.BlockSpec((1, d_h1), resident),               # b1
            pl.BlockSpec((d_h1, d_h2), resident),            # w2
            pl.BlockSpec((1, d_h2), resident),                # b2
            pl.BlockSpec((d_h2, d_out), resident),            # w3
            pl.BlockSpec((1, d_out), resident),               # b3
        ],
        out_specs=pl.BlockSpec((tb, d_out), lambda i: (i, 0)),
        compiler_params=pltpu.CompilerParams(
            dimension_semantics=("parallel",),   # megacore sharding on v7x
            vmem_limit_bytes=32 << 20,
        ),
        cost_estimate=cost,
    )(xk, w1, b1, w2, b2, w3, b3)

    return out[:B] if b_pad != B else out


def init_params(key, dims):
    """Deterministic init mimicking nn.Linear default (uniform +- 1/sqrt(fan_in))."""
    params = []
    for d_in, d_out in zip(dims[:-1], dims[1:]):
        key, kw, kb = jax.random.split(key, 3)
        bound = 1.0 / float(jnp.sqrt(jnp.float32(d_in)))
        # stored as (in, out) so kernel does x @ W (torch stores (out, in), does x @ W.T)
        w = jax.random.uniform(kw, (d_in, d_out), jnp.float32, -bound, bound)
        b = jax.random.uniform(kb, (1, d_out), jnp.float32, -bound, bound)
        params.append((w, b))
    return tuple(params)


def reference_forward(x, params):
    (w1, b1), (w2, b2), (w3, b3) = params
    h = jnp.maximum(x @ w1 + b1, 0.0)
    h = jnp.maximum(h @ w2 + b2, 0.0)
    return h @ w3 + b3


if __name__ == "__main__":
    key = jax.random.PRNGKey(0)
    k_x, k_p = jax.random.split(key)

    B, D0, D1, D2, D3 = 512, 32, 64, 64, 16
    x = jax.random.normal(k_x, (B, D0), jnp.float32)
    params = init_params(k_p, (D0, D1, D2, D3))

    # Tile selection picks tb=256 here -> grid=(2,), no padding pass over x,
    # exercising both the pipelined batch grid and v7x's 2-TC sharding.
    out = neural_net_forward(x, params)
    out = jax.block_until_ready(out)

    ref = reference_forward(x, params)
    assert out.shape == (B, D3)
    # f32 storage end-to-end; tolerance only covers possible bf16-pass MXU matmuls.
    assert jnp.allclose(out, ref, atol=2e-2, rtol=2e-2), float(
        jnp.max(jnp.abs(out - ref)))

    print("KERNEL_OK")
</pallas_src>

<mosaic_0001>
module attributes {stable_mosaic.version = 11 : i64} {
  func.func @mlp_kernel(%arg0: i32, %arg1: memref<256x32xf32, #tpu.memory_space<vmem>>, %arg2: memref<32x64xf32, #tpu.memory_space<vmem>>, %arg3: memref<1x64xf32, #tpu.memory_space<vmem>>, %arg4: memref<64x64xf32, #tpu.memory_space<vmem>>, %arg5: memref<1x64xf32, #tpu.memory_space<vmem>>, %arg6: memref<64x16xf32, #tpu.memory_space<vmem>>, %arg7: memref<1x16xf32, #tpu.memory_space<vmem>>, %arg8: memref<256x16xf32, #tpu.memory_space<vmem>>) attributes {dimension_semantics = [#tpu.dimension_semantics<parallel>], iteration_bounds = array<i64: 2>, scalar_prefetch = 0 : i64, scratch_operands = 0 : i64, tpu.core_type = #tpu.core_type<tc>, window_params = [{transform_indices = @transform_0, window_bounds = array<i64: 256, 32>}, {pipeline_mode = #tpu.pipeline_mode<synchronous>, transform_indices = @transform_1, window_bounds = array<i64: 32, 64>}, {pipeline_mode = #tpu.pipeline_mode<synchronous>, transform_indices = @transform_2, window_bounds = array<i64: 1, 64>}, {pipeline_mode = #tpu.pipeline_mode<synchronous>, transform_indices = @transform_3, window_bounds = array<i64: 64, 64>}, {pipeline_mode = #tpu.pipeline_mode<synchronous>, transform_indices = @transform_4, window_bounds = array<i64: 1, 64>}, {pipeline_mode = #tpu.pipeline_mode<synchronous>, transform_indices = @transform_5, window_bounds = array<i64: 64, 16>}, {pipeline_mode = #tpu.pipeline_mode<synchronous>, transform_indices = @transform_6, window_bounds = array<i64: 1, 16>}, {transform_indices = @transform_7, window_bounds = array<i64: 256, 16>}]} {
    %c0 = arith.constant 0 : index
    %c0_0 = arith.constant 0 : index
    %0 = vector.load %arg1[%c0, %c0_0] : memref<256x32xf32, #tpu.memory_space<vmem>>, vector<256x32xf32>
    %c0_1 = arith.constant 0 : index
    %c0_2 = arith.constant 0 : index
    %1 = vector.load %arg2[%c0_1, %c0_2] : memref<32x64xf32, #tpu.memory_space<vmem>>, vector<32x64xf32>
    %cst = arith.constant dense<0.000000e+00> : vector<256x64xf32>
    %2 = tpu.matmul %0, %1, %cst {dimension_numbers = #tpu.dot_dimension_numbers<[1], [0], [0], [1], [0, 0, 1, 1], [], []>} : vector<256x32xf32>, vector<32x64xf32>, vector<256x64xf32> -> vector<256x64xf32>
    %c0_3 = arith.constant 0 : index
    %c0_4 = arith.constant 0 : index
    %3 = vector.load %arg3[%c0_3, %c0_4] : memref<1x64xf32, #tpu.memory_space<vmem>>, vector<1x64xf32>
    %4 = vector.broadcast %3 : vector<1x64xf32> to vector<256x64xf32>
    %5 = arith.addf %2, %4 : vector<256x64xf32>
    %cst_5 = arith.constant 0.000000e+00 : f32
    %6 = vector.broadcast %cst_5 : f32 to vector<256x64xf32>
    %7 = arith.maximumf %5, %6 : vector<256x64xf32>
    %c0_6 = arith.constant 0 : index
    %c0_7 = arith.constant 0 : index
    %8 = vector.load %arg4[%c0_6, %c0_7] : memref<64x64xf32, #tpu.memory_space<vmem>>, vector<64x64xf32>
    %cst_8 = arith.constant dense<0.000000e+00> : vector<256x64xf32>
    %9 = tpu.matmul %7, %8, %cst_8 {dimension_numbers = #tpu.dot_dimension_numbers<[1], [0], [0], [1], [0, 0, 1, 1], [], []>} : vector<256x64xf32>, vector<64x64xf32>, vector<256x64xf32> -> vector<256x64xf32>
    %c0_9 = arith.constant 0 : index
    %c0_10 = arith.constant 0 : index
    %10 = vector.load %arg5[%c0_9, %c0_10] : memref<1x64xf32, #tpu.memory_space<vmem>>, vector<1x64xf32>
    %11 = vector.broadcast %10 : vector<1x64xf32> to vector<256x64xf32>
    %12 = arith.addf %9, %11 : vector<256x64xf32>
    %cst_11 = arith.constant 0.000000e+00 : f32
    %13 = vector.broadcast %cst_11 : f32 to vector<256x64xf32>
    %14 = arith.maximumf %12, %13 : vector<256x64xf32>
    %c0_12 = arith.constant 0 : index
    %c0_13 = arith.constant 0 : index
    %15 = vector.load %arg6[%c0_12, %c0_13] : memref<64x16xf32, #tpu.memory_space<vmem>>, vector<64x16xf32>
    %cst_14 = arith.constant dense<0.000000e+00> : vector<256x16xf32>
    %16 = tpu.matmul %14, %15, %cst_14 {dimension_numbers = #tpu.dot_dimension_numbers<[1], [0], [0], [1], [0, 0, 1, 1], [], []>} : vector<256x64xf32>, vector<64x16xf32>, vector<256x16xf32> -> vector<256x16xf32>
    %c0_15 = arith.constant 0 : index
    %c0_16 = arith.constant 0 : index
    %17 = vector.load %arg7[%c0_15, %c0_16] : memref<1x16xf32, #tpu.memory_space<vmem>>, vector<1x16xf32>
    %18 = vector.broadcast %17 : vector<1x16xf32> to vector<256x16xf32>
    %19 = arith.addf %16, %18 : vector<256x16xf32>
    %c0_17 = arith.constant 0 : index
    %c0_18 = arith.constant 0 : index
    %20 = vector.load %arg8[%c0_17, %c0_18] : memref<256x16xf32, #tpu.memory_space<vmem>>, vector<256x16xf32>
    tpu.vector_store %arg8[%c0_17, %c0_18], %19 {strides = array<i32>} : memref<256x16xf32, #tpu.memory_space<vmem>>, vector<256x16xf32>,
    return
  }
  func.func @transform_0(%arg0: i32) -> (i32, i32) {
    %c0_i32 = arith.constant 0 : i32
    %c0_i32_0 = arith.constant 0 : i32
    return %arg0, %c0_i32 : i32, i32
  }
  func.func @transform_1(%arg0: i32) -> (i32, i32) {
    %c0_i32 = arith.constant 0 : i32
    %c0_i32_0 = arith.constant 0 : i32
    %c0_i32_1 = arith.constant 0 : i32
    return %c0_i32, %c0_i32_0 : i32, i32
  }
  func.func @transform_2(%arg0: i32) -> (i32, i32) {
    %c0_i32 = arith.constant 0 : i32
    %c0_i32_0 = arith.constant 0 : i32
    %c0_i32_1 = arith.constant 0 : i32
    return %c0_i32, %c0_i32_0 : i32, i32
  }
  func.func @transform_3(%arg0: i32) -> (i32, i32) {
    %c0_i32 = arith.constant 0 : i32
    %c0_i32_0 = arith.constant 0 : i32
    %c0_i32_1 = arith.constant 0 : i32
    return %c0_i32, %c0_i32_0 : i32, i32
  }
  func.func @transform_4(%arg0: i32) -> (i32, i32) {
    %c0_i32 = arith.constant 0 : i32
    %c0_i32_0 = arith.constant 0 : i32
    %c0_i32_1 = arith.constant 0 : i32
    return %c0_i32, %c0_i32_0 : i32, i32
  }
  func.func @transform_5(%arg0: i32) -> (i32, i32) {
    %c0_i32 = arith.constant 0 : i32
    %c0_i32_0 = arith.constant 0 : i32
    %c0_i32_1 = arith.constant 0 : i32
    return %c0_i32, %c0_i32_0 : i32, i32
  }
  func.func @transform_6(%arg0: i32) -> (i32, i32) {
    %c0_i32 = arith.constant 0 : i32
    %c0_i32_0 = arith.constant 0 : i32
    %c0_i32_1 = arith.constant 0 : i32
    return %c0_i32, %c0_i32_0 : i32, i32
  }
  func.func @transform_7(%arg0: i32) -> (i32, i32) {
    %c0_i32 = arith.constant 0 : i32
    %c0_i32_0 = arith.constant 0 : i32
    return %arg0, %c0_i32 : i32, i32
  }
}

</mosaic_0001>

<bundles_post_ra>
// kernel: tpu_custom_call.1
= control target key start
LH: loop header
LB: loop body
LE: loop exit
PB: predicated region body
PF: predicated region fallthrough
CT: control target
= control target key end

     0   :  { %s1947_s24 = smov 0   ;;  %s2347_s0 = inlined_call_operand.vmem [shape: f32[512,32], index: 0, kind: input, shape index: {}]   ;;  %s2348_s1 = inlined_call_operand.vmem [shape: f32[32,64], index: 1, kind: input, shape index: {}]   ;;  %s2349_s2 = inlined_call_operand.vmem [shape: f32[1,64], index: 2, kind: input, shape index: {}]   ;;  %s2350_s3 = inlined_call_operand.vmem [shape: f32[64,64], index: 3, kind: input, shape index: {}]   ;;  %s2351_s4 = inlined_call_operand.vmem [shape: f32[1,64], index: 4, kind: input, shape index: {}]   ;;  %s2352_s5 = inlined_call_operand.vmem [shape: f32[64,16], index: 5, kind: input, shape index: {}]   ;;  %s2353_s6 = inlined_call_operand.vmem [shape: f32[1,16], index: 6, kind: input, shape index: {}]   ;;  %s2354_s7 = inlined_call_operand.vmem [shape: f32[512,16], index: 7, kind: output, shape index: {}]  }
   0x1 LB: > { %s1473_s25 = sadd.s32 4294967295, %s1905_s24   ;;  %p1477_p0 = scmp.ge.s32.totalorder %s1905_s24, 1  ;;  %s1905_s24 = sphi %s1947_s24, %s17_s24  }
   0x2   : > { %p238_p1 = scmp.lt.s32.totalorder %s1905_s24, 3 }
   0x4   : > { %p239_p2 = pnand %p1477_p0, %p238_p1 }
   0x5   : > { %s1478_s30 = sshll.u32 (!%p239_p2), %s1473_s25, 5 }
   0x6   : > { %242 = sbr.rel (%p239_p2) target bundleno = 678 (0x2a6), region = 48  ;;  %p271_p3 = scmp.lt.s32.totalorder (!%p239_p2), %s1478_s30, 63 }
   0xb   : > { %v317_v0 = vld [vmem:[%s2348_s1 + $0x18] sm:$0xff]  ;;  %v316_v1 = vld [vmem:[%s2348_s1 + $0x10] sm:$0xff]  ;;  %v315_v2 = vld [vmem:[%s2348_s1 + $0x8] sm:$0xff]  ;;  %s2356_s30 = smov (!%p271_p3, %s1478_s30), 63  ;;  %vm325_vm0 = vcmask 261120   ;;  %vm694_vm1 = vcmask 523264  }
   0xc   : > { %1699 = vmatprep.subr.mxu0 %v317_v0  ;;  %1883 = vmatprep.subr.mxu1 %v317_v0  ;;  %v314_v3 = vld [vmem:[%s2348_s1] sm:$0xff]  ;;  %s1479_s12 = sshll.u32 %s2356_s30, 3  ;;  %v686_v4 = vld [vmem:[%s2350_s3 + $0x38] sm:$0xff]  ;;  %v685_v13 = vld [vmem:[%s2350_s3 + $0x30] sm:$0xff]  ;;  %vm1384_vm2 = vcmask 130048  }
   0xd   : > { %1700 = vmatpush3.msra.mxu0 %v317_v0  ;;  %1887 = vmatpush3.msra.mxu1 %v317_v0  ;;  %s1975_s15 = scalar_lea.vmem %s2347_s0, %s1479_s12  ;;  %v684_v18 = vld [vmem:[%s2350_s3 + $0x28] sm:$0xff]  ;;  %v683_v20 = vld [vmem:[%s2350_s3 + $0x20] sm:$0xff]  ;;  %v682_v24 = vld [vmem:[%s2350_s3 + $0x18] sm:$0xff]  ;;  %s2246_s17 = scalar_lea.vmem %s2354_s7, %s1479_s12 }
   0xe   : > { %1701 = vmatprep.subr.mxu0 %v316_v1  ;;  %1884 = vmatprep.subr.mxu1 %v316_v1  ;;  %v282_v5 = vld [vmem:[%s1975_s15] sm:$0xff]  ;;  %v283_v6 = vld [vmem:[%s1975_s15 + $0x8] sm:$0xff]  ;;  %v284_v7 = vld [vmem:[%s1975_s15 + $0x10] sm:$0xff] }
   0xf   : > { %1702 = vmatpush3.msra.mxu0 %v316_v1  ;;  %1888 = vmatpush3.msra.mxu1 %v316_v1  ;;  %v285_v8 = vld [vmem:[%s1975_s15 + $0x18] sm:$0xff]  ;;  %v286_v9 = vld [vmem:[%s1975_s15 + $0x20] sm:$0xff]  ;;  %v299_v11 = vld [vmem:[%s1975_s15 + $0x88] sm:$0xff] }
  0x10   : > { %1703 = vmatprep.subr.mxu0 %v315_v2  ;;  %1885 = vmatprep.subr.mxu1 %v315_v2  ;;  %v298_v10 = vld [vmem:[%s1975_s15 + $0x80] sm:$0xff]  ;;  %v300_v12 = vld [vmem:[%s1975_s15 + $0x90] sm:$0xff]  ;;  %v287_v14 = vld [vmem:[%s1975_s15 + $0x28] sm:$0xff] }
  0x11   : > { %1704 = vmatpush3.msra.mxu0 %v315_v2  ;;  %1889 = vmatpush3.msra.mxu1 %v315_v2  ;;  %v288_v15 = vld [vmem:[%s1975_s15 + $0x30] sm:$0xff]  ;;  %v301_v16 = vld [vmem:[%s1975_s15 + $0x98] sm:$0xff]  ;;  %v302_v17 = vld [vmem:[%s1975_s15 + $0xa0] sm:$0xff] }
  0x12   : > { %1705 = vmatprep.subr.mxu0 %v314_v3  ;;  %1886 = vmatprep.subr.mxu1 %v314_v3  ;;  %v289_v19 = vld [vmem:[%s1975_s15 + $0x38] sm:$0xff]  ;;  %v290_v21 = vld [vmem:[%s1975_s15 + $0x40] sm:$0xff]  ;;  %v303_v22 = vld [vmem:[%s1975_s15 + $0xa8] sm:$0xff] }
  0x13   : > { %1706 = vmatpush3.msra.mxu0 %v314_v3  ;;  %1707 = vmatprep.mubr.msk.f32.mxu0 %vm325_vm0, %v282_v5  ;;  %v304_v23 = vld [vmem:[%s1975_s15 + $0xb0] sm:$0xff]  ;;  %v291_v25 = vld [vmem:[%s1975_s15 + $0x48] sm:$0xff]  ;;  %v305_v27 = vld [vmem:[%s1975_s15 + $0xb8] sm:$0xff] }
  0x14   : > { %1708 = vmatmul.mubr.msk.f32.vlgmr.msra.gmra.mxu0 %vm325_vm0, %v283_v6  ;;  %1890 = vmatpush3.msra.mxu1 %v314_v3  ;;  %v292_v26 = vld [vmem:[%s1975_s15 + $0x50] sm:$0xff]  ;;  %v306_v28 = vld [vmem:[%s1975_s15 + $0xc0] sm:$0xff]  ;;  %v293_v30 = vld [vmem:[%s1975_s15 + $0x58] sm:$0xff] }
  0x15   : > { %1710 = vmatprep.mubr.msk.f32.mxu0 %vm325_vm0, %v284_v7  ;;  %1755 = vmatprep.subr.mxu1 %v686_v4  ;;  %v681_v29 = vld [vmem:[%s2350_s3 + $0x10] sm:$0xff]  ;;  %v680_v31 = vld [vmem:[%s2350_s3 + $0x8] sm:$0xff]  ;;  %v294_v32 = vld [vmem:[%s1975_s15 + $0x60] sm:$0xff] }
  0x16   : > { %1731 = vmatprep.mubr.msk.f32.mxu1 %vm325_vm0, %v298_v10  ;;  %v307_v33 = vld [vmem:[%s1975_s15 + $0xc8] sm:$0xff]  ;;  %v308_v34 = vld [vmem:[%s1975_s15 + $0xd0] sm:$0xff]  ;;  %v309_v37 = vld [vmem:[%s1975_s15 + $0xd8] sm:$0xff] }
  0x17   : > { %1732 = vmatmul.mubr.msk.f32.vlgmr.msra.gmra.mxu1 %vm325_vm0, %v299_v11  ;;  %v295_v35 = vld [vmem:[%s1975_s15 + $0x68] sm:$0xff]  ;;  %v296_v36 = vld [vmem:[%s1975_s15 + $0x70] sm:$0xff]  ;;  %v310_v38 = vld [vmem:[%s1975_s15 + $0xe0] sm:$0xff] }
  0x18   : > { %1711 = vmatmul.mubr.msk.f32.gmra.mxu0 %vm325_vm0, %v285_v8  ;;  %1734 = vmatprep.mubr.msk.f32.mxu1 %vm325_vm0, %v300_v12  ;;  %v297_v39 = vld [vmem:[%s1975_s15 + $0x78] sm:$0xff]  ;;  %v311_v40 = vld [vmem:[%s1975_s15 + $0xe8] sm:$0xff]  ;;  %v312_v41 = vld [vmem:[%s1975_s15 + $0xf0] sm:$0xff] }
  0x19   : > { %1713 = vmatprep.mubr.msk.f32.mxu0 %vm325_vm0, %v286_v9  ;;  %1756 = vmatpush3.msra.mxu1 %v686_v4  ;;  %v313_v42 = vld [vmem:[%s1975_s15 + $0xf8] sm:$0xff]  ;;  %v679_v43 = vld [vmem:[%s2350_s3] sm:$0xff]  ;;  %v1054_v45 = vld [vmem:[%s2352_s5 + $0x30] sm:$0xff] }
  0x1a   : > { %1757 = vmatprep.subr.mxu1 %v685_v13  ;;  %v1055_v44 = vld [vmem:[%s2352_s5 + $0x38] sm:$0xff]  ;;  %v1053_v46 = vld [vmem:[%s2352_s5 + $0x28] sm:$0xff]  ;;  %v1052_v47 = vld [vmem:[%s2352_s5 + $0x20] sm:$0xff] }
  0x1b   : > { %1758 = vmatpush3.msra.mxu1 %v685_v13  ;;  %1819 = vmatprep.subr.mxu0 %v1055_v44  ;;  %v1051_v48 = vld [vmem:[%s2352_s5 + $0x18] sm:$0xff]  ;;  %v1050_v49 = vld [vmem:[%s2352_s5 + $0x10] sm:$0xff]  ;;  %v1049_v50 = vld [vmem:[%s2352_s5 + $0x8] sm:$0xff] }
  0x1c   : > { %1714 = vmatmul.mubr.msk.f32.gmra.mxu0 %vm325_vm0, %v287_v14  ;;  %1735 = vmatmul.mubr.msk.f32.gmra.mxu1 %vm325_vm0, %v301_v16  ;;  %v2089_v51 = vld [vmem:[%s2349_s2] ss:$0 sm:$0xff] }
  0x1d   : > { %1716 = vmatprep.mubr.msk.f32.mxu0 %vm325_vm0, %v288_v15  ;;  %1737 = vmatprep.mubr.msk.f32.mxu1 %vm325_vm0, %v302_v17 }
  0x1e   : > { %1759 = vmatprep.subr.mxu1 %v684_v18  ;;  %1820 = vmatpush3.msra.mxu0 %v1055_v44 }
  0x1f   : > { %1760 = vmatpush3.msra.mxu1 %v684_v18  ;;  %1821 = vmatprep.subr.mxu0 %v1054_v45 }
  0x20   : > { %1717 = vmatmul.mubr.msk.f32.gmra.mxu0 %vm325_vm0, %v289_v19  ;;  %1761 = vmatprep.subr.mxu1 %v683_v20 }
  0x21   : > { %1719 = vmatprep.mubr.msk.f32.mxu0 %vm325_vm0, %v290_v21  ;;  %1738 = vmatmul.mubr.msk.f32.gmra.mxu1 %vm325_vm0, %v303_v22 }
  0x22   : > { %1740 = vmatprep.mubr.msk.f32.mxu1 %vm325_vm0, %v304_v23  ;;  %1762 = vmatpush3.msra.mxu1 %v683_v20 }
  0x23   : > { %1763 = vmatprep.subr.mxu1 %v682_v24  ;;  %1822 = vmatpush3.msra.mxu0 %v1054_v45 }
  0x24   : > { %1720 = vmatmul.mubr.msk.f32.gmra.mxu0 %vm325_vm0, %v291_v25  ;;  %1764 = vmatpush3.msra.mxu1 %v682_v24 }
  0x25   : > { %1722 = vmatprep.mubr.msk.f32.mxu0 %vm325_vm0, %v292_v26  ;;  %1741 = vmatmul.mubr.msk.f32.gmra.mxu1 %vm325_vm0, %v305_v27 }
  0x26   : > { %1743 = vmatprep.mubr.msk.f32.mxu1 %vm325_vm0, %v306_v28  ;;  %1765 = vmatprep.subr.mxu1 %v681_v29 }
  0x27   : > { %1766 = vmatpush3.msra.mxu1 %v681_v29  ;;  %1823 = vmatprep.subr.mxu0 %v1053_v46 }
  0x28   : > { %1723 = vmatmul.mubr.msk.f32.gmra.mxu0 %vm325_vm0, %v293_v30  ;;  %1767 = vmatprep.subr.mxu1 %v680_v31 }
  0x29   : > { %1725 = vmatprep.mubr.msk.f32.mxu0 %vm325_vm0, %v294_v32  ;;  %1744 = vmatmul.mubr.msk.f32.gmra.mxu1 %vm325_vm0, %v307_v33 }
  0x2a   : > { %1746 = vmatprep.mubr.msk.f32.mxu1 %vm325_vm0, %v308_v34  ;;  %1768 = vmatpush3.msra.mxu1 %v680_v31 }
  0x2b   : > { %1769 = vmatprep.subr.mxu1 %v679_v43  ;;  %1824 = vmatpush3.msra.mxu0 %v1053_v46 }
  0x2c   : > { %1726 = vmatmul.mubr.msk.f32.gmra.mxu0 %vm325_vm0, %v295_v35  ;;  %1770 = vmatpush3.msra.mxu1 %v679_v43 }
  0x2d   : > { %1728 = vmatprep.mubr.msk.f32.mxu0 %vm325_vm0, %v296_v36  ;;  %1747 = vmatmul.mubr.msk.f32.gmra.mxu1 %vm325_vm0, %v309_v37 }
  0x2e   : > { %1749 = vmatprep.mubr.msk.f32.mxu1 %vm325_vm0, %v310_v38  ;;  %1825 = vmatprep.subr.mxu0 %v1052_v47 }
  0x2f   : > { %1826 = vmatpush3.msra.mxu0 %v1052_v47 }
  0x30   : > { %1729 = vmatmul.mubr.msk.f32.gmra.mxu0 %vm325_vm0, %v297_v39  ;;  %1827 = vmatprep.subr.mxu0 %v1051_v48 }
  0x31   : > { %1750 = vmatmul.mubr.msk.f32.gmra.mxu1 %vm325_vm0, %v311_v40  ;;  %1828 = vmatpush3.msra.mxu0 %v1051_v48 }
  0x32   : > { %1752 = vmatprep.mubr.msk.f32.mxu1 %vm325_vm0, %v312_v41  ;;  %1829 = vmatprep.subr.mxu0 %v1050_v49 }
  0x33   : > { %1830 = vmatpush3.msra.mxu0 %v1050_v49 }
  0x34   : > { %1831 = vmatprep.subr.mxu0 %v1049_v50 }
  0x35   : > { %1753 = vmatmul.mubr.msk.f32.gmra.mxu1 %vm325_vm0, %v313_v42  ;;  %1832 = vmatpush3.msra.mxu0 %v1049_v50 }
  0xd4   : > { %v1709_v52 = vpop.f32.mrf.mxu0 }
  0xd5   : > { %v494_v53 = vadd.f32 %v1709_v52, %v2089_v51 }
  0xd6   : > { %v488_v54 = vpop.f32.mrf.mxu0 }
  0xd7   : > { %v489_v55 = vadd.f32 %v2089_v51, %v488_v54  ;;  %v2093_v58 = vpop.f32.mrf.mxu1  ;;  %v648_v59 = vmax.f32 %v494_v53, 0.0 }
  0xd8   : > { %v1712_v56 = vpop.f32.mrf.mxu0  ;;  %v574_v49 = vadd.f32 %v2093_v58, %v2089_v51 }
  0xd9   : > { %v647_v57 = vmax.f32 %v489_v55, 0.0  ;;  %v504_v60 = vadd.f32 %v1712_v56, %v2089_v51  ;;  %v568_v63 = vpop.f32.mrf.mxu1 }
  0xda   : > { %v498_v61 = vpop.f32.mrf.mxu0  ;;  %v569_v39 = vadd.f32 %v2089_v51, %v568_v63  ;;  %v664_v54 = vmax.f32 %v574_v49, 0.0 }
  0xdb   : > { %v499_v62 = vadd.f32 %v2089_v51, %v498_v61  ;;  %1771 = vmatprep.mubr.msk.f32.mxu1 %vm694_vm1, %v647_v57  ;;  %v650_v3 = vmax.f32 %v504_v60, 0.0 }
  0xdc   : > { %v1715_v0 = vpop.f32.mrf.mxu0  ;;  %1772 = vmatmul.mubr.msk.f32.vlgmr.msra.gmra.mxu1 %vm694_vm1, %v648_v59  ;;  %v2099_v2 = vpop.f32.mrf.mxu1  ;;  %v663_v46 = vmax.f32 %v569_v39, 0.0 }
  0xdd   : > { %v649_v1 = vmax.f32 %v499_v62, 0.0  ;;  %v514_v4 = vadd.f32 %v1715_v0, %v2089_v51  ;;  %v584_v55 = vadd.f32 %v2099_v2, %v2089_v51 }
  0xde   : > { %v508_v5 = vpop.f32.mrf.mxu0  ;;  %v578_v7 = vpop.f32.mrf.mxu1 }
  0xdf   : > { %v509_v6 = vadd.f32 %v2089_v51, %v508_v5  ;;  %1774 = vmatprep.mubr.msk.f32.mxu1 %vm694_vm1, %v649_v1  ;;  %v652_v11 = vmax.f32 %v514_v4, 0.0  ;;  %v579_v47 = vadd.f32 %v2089_v51, %v578_v7  ;;  %v666_v59 = vmax.f32 %v584_v55, 0.0 }
  0xe0   : > { %v1718_v8 = vpop.f32.mrf.mxu0  ;;  %1775 = vmatmul.mubr.msk.f32.gmra.mxu1 %vm694_vm1, %v650_v3 }
  0xe1   : > { %v651_v9 = vmax.f32 %v509_v6, 0.0  ;;  %v2105_v10 = vpop.f32.mrf.mxu1  ;;  %v524_v12 = vadd.f32 %v1718_v8, %v2089_v51  ;;  %v665_v52 = vmax.f32 %v579_v47, 0.0 }
  0xe2   : > { %v518_v13 = vpop.f32.mrf.mxu0  ;;  %v594_v60 = vadd.f32 %v2105_v10, %v2089_v51 }
  0xe3   : > { %v519_v14 = vadd.f32 %v2089_v51, %v518_v13  ;;  %1777 = vmatprep.mubr.msk.f32.mxu1 %vm694_vm1, %v651_v9  ;;  %v588_v15 = vpop.f32.mrf.mxu1  ;;  %v654_v18 = vmax.f32 %v524_v12, 0.0 }
  0xe4   : > { %v1721_v16 = vpop.f32.mrf.mxu0  ;;  %1778 = vmatmul.mubr.msk.f32.gmra.mxu1 %vm694_vm1, %v652_v11  ;;  %v589_v53 = vadd.f32 %v2089_v51, %v588_v15  ;;  %v668_v0 = vmax.f32 %v594_v60, 0.0 }
  0xe5   : > { %v653_v17 = vmax.f32 %v519_v14, 0.0  ;;  %v534_v19 = vadd.f32 %v1721_v16, %v2089_v51  ;;  %v1742_v21 = vpop.f32.mrf.mxu1 }
  0xe6   : > { %v528_v20 = vpop.f32.mrf.mxu0  ;;  %v667_v57 = vmax.f32 %v589_v53, 0.0  ;;  %v604_v1 = vadd.f32 %v1742_v21, %v2089_v51  ;;  %v1048_v21 = vld [vmem:[%s2352_s5] sm:$0xff] }
  0xe7   : > { %v529_v22 = vadd.f32 %v2089_v51, %v528_v20  ;;  %1780 = vmatprep.mubr.msk.f32.mxu1 %vm694_vm1, %v653_v17  ;;  %v656_v25 = vmax.f32 %v534_v19, 0.0  ;;  %v598_v28 = vpop.f32.mrf.mxu1  ;;  %1833 = vmatprep.subr.mxu0 %v1048_v21 }
  0xe8   : > { %v1724_v23 = vpop.f32.mrf.mxu0  ;;  %1781 = vmatmul.mubr.msk.f32.gmra.mxu1 %vm694_vm1, %v654_v18  ;;  %v599_v58 = vadd.f32 %v2089_v51, %v598_v28  ;;  %v670_v5 = vmax.f32 %v604_v1, 0.0  ;;  %1834 = vmatpush3.msra.mxu0 %v1048_v21 }
  0xe9   : > { %v655_v24 = vmax.f32 %v529_v22, 0.0  ;;  %v544_v26 = vadd.f32 %v1724_v23, %v2089_v51  ;;  %v1745_v35 = vpop.f32.mrf.mxu1  ;;  %v2170_v22 = vld [vmem:[%s2351_s4] ss:$0 sm:$0xff] }
  0xea   : > { %v538_v27 = vpop.f32.mrf.mxu0  ;;  %v669_v62 = vmax.f32 %v599_v58, 0.0  ;;  %v614_v6 = vadd.f32 %v1745_v35, %v2089_v51 }
  0xeb   : > { %v539_v29 = vadd.f32 %v2089_v51, %v538_v27  ;;  %1783 = vmatprep.mubr.msk.f32.mxu1 %vm694_vm1, %v655_v24  ;;  %v658_v32 = vmax.f32 %v544_v26, 0.0  ;;  %v608_v43 = vpop.f32.mrf.mxu1 }
  0xec   : > { %v1727_v30 = vpop.f32.mrf.mxu0  ;;  %1784 = vmatmul.mubr.msk.f32.gmra.mxu1 %vm694_vm1, %v656_v25  ;;  %v609_v63 = vadd.f32 %v2089_v51, %v608_v43  ;;  %v672_v10 = vmax.f32 %v614_v6, 0.0 }
  0xed   : > { %v657_v31 = vmax.f32 %v539_v29, 0.0  ;;  %v554_v33 = vadd.f32 %v1727_v30, %v2089_v51  ;;  %v1748_v50 = vpop.f32.mrf.mxu1 }
  0xee   : > { %v548_v34 = vpop.f32.mrf.mxu0  ;;  %v671_v3 = vmax.f32 %v609_v63, 0.0  ;;  %v624_v11 = vadd.f32 %v1748_v50, %v2089_v51 }
  0xef   : > { %v549_v36 = vadd.f32 %v2089_v51, %v548_v34  ;;  %1786 = vmatprep.mubr.msk.f32.mxu1 %vm694_vm1, %v657_v31  ;;  %v660_v40 = vmax.f32 %v554_v33, 0.0  ;;  %v618_v56 = vpop.f32.mrf.mxu1 }
  0xf0   : > { %v1730_v37 = vpop.f32.mrf.mxu0  ;;  %1787 = vmatmul.mubr.msk.f32.gmra.mxu1 %vm694_vm1, %v658_v32  ;;  %v619_v4 = vadd.f32 %v2089_v51, %v618_v56  ;;  %v674_v15 = vmax.f32 %v624_v11, 0.0 }
  0xf1   : > { %v659_v38 = vmax.f32 %v549_v36, 0.0  ;;  %v564_v41 = vadd.f32 %v1730_v37, %v2089_v51  ;;  %v1751_v61 = vpop.f32.mrf.mxu1 }
  0xf2   : > { %v558_v42 = vpop.f32.mrf.mxu0  ;;  %v673_v8 = vmax.f32 %v619_v4, 0.0  ;;  %v634_v16 = vadd.f32 %v1751_v61, %v2089_v51 }
  0xf3   : > { %v559_v44 = vadd.f32 %v2089_v51, %v558_v42  ;;  %1789 = vmatprep.mubr.msk.f32.mxu1 %vm694_vm1, %v659_v38  ;;  %v662_v48 = vmax.f32 %v564_v41, 0.0  ;;  %v628_v2 = vpop.f32.mrf.mxu1 }
  0xf4   : > { %1790 = vmatmul.mubr.msk.f32.gmra.mxu1 %vm694_vm1, %v660_v40  ;;  %v629_v9 = vadd.f32 %v2089_v51, %v628_v2  ;;  %v676_v18 = vmax.f32 %v634_v16, 0.0 }
  0xf5   : > { %v661_v45 = vmax.f32 %v559_v44, 0.0  ;;  %v1754_v7 = vpop.f32.mrf.mxu1 }
  0xf6   : > { %v675_v13 = vmax.f32 %v629_v9, 0.0  ;;  %v644_v19 = vadd.f32 %v1754_v7, %v2089_v51 }
  0xf7   : > { %1792 = vmatprep.mubr.msk.f32.mxu1 %vm694_vm1, %v661_v45  ;;  %v638_v12 = vpop.f32.mrf.mxu1 }
  0xf8   : > { %1793 = vmatmul.mubr.msk.f32.gmra.mxu1 %vm694_vm1, %v662_v48  ;;  %v639_v14 = vadd.f32 %v2089_v51, %v638_v12  ;;  %v678_v20 = vmax.f32 %v644_v19, 0.0 }
  0xf9   : > { %1795 = vmatprep.mubr.msk.f32.mxu1 %vm694_vm1, %v663_v46 }
  0xfa   : > { %v677_v17 = vmax.f32 %v639_v14, 0.0 }
  0xfc   : > { %1796 = vmatmul.mubr.msk.f32.gmra.mxu1 %vm694_vm1, %v664_v54 }
  0xfd   : > { %1798 = vmatprep.mubr.msk.f32.mxu1 %vm694_vm1, %v665_v52 }
 0x100   : > { %1799 = vmatmul.mubr.msk.f32.gmra.mxu1 %vm694_vm1, %v666_v59 }
 0x101   : > { %1801 = vmatprep.mubr.msk.f32.mxu1 %vm694_vm1, %v667_v57 }
 0x104   : > { %1802 = vmatmul.mubr.msk.f32.gmra.mxu1 %vm694_vm1, %v668_v0 }
 0x105   : > { %1804 = vmatprep.mubr.msk.f32.mxu1 %vm694_vm1, %v669_v62 }
 0x108   : > { %1805 = vmatmul.mubr.msk.f32.gmra.mxu1 %vm694_vm1, %v670_v5 }
 0x109   : > { %1807 = vmatprep.mubr.msk.f32.mxu1 %vm694_vm1, %v671_v3 }
 0x10c   : > { %1808 = vmatmul.mubr.msk.f32.gmra.mxu1 %vm694_vm1, %v672_v10 }
 0x10d   : > { %1810 = vmatprep.mubr.msk.f32.mxu1 %vm694_vm1, %v673_v8 }
 0x110   : > { %1811 = vmatmul.mubr.msk.f32.gmra.mxu1 %vm694_vm1, %v674_v15 }
 0x111   : > { %1813 = vmatprep.mubr.msk.f32.mxu1 %vm694_vm1, %v675_v13 }
 0x114   : > { %1814 = vmatmul.mubr.msk.f32.gmra.mxu1 %vm694_vm1, %v676_v18 }
 0x115   : > { %1816 = vmatprep.mubr.msk.f32.mxu1 %vm694_vm1, %v677_v17 }
 0x118   : > { %1817 = vmatmul.mubr.msk.f32.gmra.mxu1 %vm694_vm1, %v678_v20 }
 0x19c   : > { %v1773_v23 = vpop.f32.mrf.mxu1 }
 0x19d   : > { %v863_v51 = vadd.f32 %v1773_v23, %v2170_v22 }
 0x19e   : > { %v857_v24 = vpop.f32.mrf.mxu1 }
 0x19f   : > { %v858_v25 = vadd.f32 %v2170_v22, %v857_v24  ;;  %v1017_v28 = vmax.f32 %v863_v51, 0.0 }
 0x1a0   : > { %v1776_v26 = vpop.f32.mrf.mxu1 }
 0x1a1   : > { %v1016_v27 = vmax.f32 %v858_v25, 0.0  ;;  %v873_v29 = vadd.f32 %v1776_v26, %v2170_v22 }
 0x1a2   : > { %v867_v30 = vpop.f32.mrf.mxu1 }
 0x1a3   : > { %v868_v31 = vadd.f32 %v2170_v22, %v867_v30  ;;  %1835 = vmatprep.mubr.msk.f32.mxu0 %vm694_vm1, %v1016_v27  ;;  %v1019_v34 = vmax.f32 %v873_v29, 0.0 }
 0x1a4   : > { %v1779_v32 = vpop.f32.mrf.mxu1  ;;  %1836 = vmatmul.mubr.msk.f32.vlgmr.msra.gmra.mxu0 %vm694_vm1, %v1017_v28 }
 0x1a5   : > { %v1018_v33 = vmax.f32 %v868_v31, 0.0  ;;  %v883_v35 = vadd.f32 %v1779_v32, %v2170_v22 }
 0x1a6   : > { %v877_v36 = vpop.f32.mrf.mxu1 }
 0x1a7   : > { %v878_v37 = vadd.f32 %v2170_v22, %v877_v36  ;;  %1838 = vmatprep.mubr.msk.f32.mxu0 %vm694_vm1, %v1018_v33  ;;  %v1021_v40 = vmax.f32 %v883_v35, 0.0 }
 0x1a8   : > { %v1782_v38 = vpop.f32.mrf.mxu1  ;;  %1839 = vmatmul.mubr.msk.f32.gmra.mxu0 %vm694_vm1, %v1019_v34 }
 0x1a9   : > { %v1020_v39 = vmax.f32 %v878_v37, 0.0  ;;  %v893_v41 = vadd.f32 %v1782_v38, %v2170_v22 }
 0x1aa   : > { %v887_v42 = vpop.f32.mrf.mxu1 }
 0x1ab   : > { %v888_v43 = vadd.f32 %v2170_v22, %v887_v42  ;;  %1841 = vmatprep.mubr.msk.f32.mxu0 %vm694_vm1, %v1020_v39  ;;  %v1023_v46 = vmax.f32 %v893_v41, 0.0 }
 0x1ac   : > { %v1785_v44 = vpop.f32.mrf.mxu1  ;;  %1842 = vmatmul.mubr.msk.f32.gmra.mxu0 %vm694_vm1, %v1021_v40 }
 0x1ad   : > { %v1022_v45 = vmax.f32 %v888_v43, 0.0  ;;  %v903_v47 = vadd.f32 %v1785_v44, %v2170_v22 }
 0x1ae   : > { %v897_v48 = vpop.f32.mrf.mxu1 }
 0x1af   : > { %v898_v49 = vadd.f32 %v2170_v22, %v897_v48  ;;  %1844 = vmatprep.mubr.msk.f32.mxu0 %vm694_vm1, %v1022_v45  ;;  %v1025_v53 = vmax.f32 %v903_v47, 0.0 }
 0x1b0   : > { %v1788_v50 = vpop.f32.mrf.mxu1  ;;  %1845 = vmatmul.mubr.msk.f32.gmra.mxu0 %vm694_vm1, %v1023_v46 }
 0x1b1   : > { %v1024_v52 = vmax.f32 %v898_v49, 0.0  ;;  %v913_v54 = vadd.f32 %v1788_v50, %v2170_v22 }
 0x1b2   : > { %v907_v55 = vpop.f32.mrf.mxu1 }
 0x1b3   : > { %v908_v56 = vadd.f32 %v2170_v22, %v907_v55  ;;  %1847 = vmatprep.mubr.msk.f32.mxu0 %vm694_vm1, %v1024_v52  ;;  %v1027_v59 = vmax.f32 %v913_v54, 0.0 }
 0x1b4   : > { %v1791_v57 = vpop.f32.mrf.mxu1  ;;  %1848 = vmatmul.mubr.msk.f32.gmra.mxu0 %vm694_vm1, %v1025_v53 }
 0x1b5   : > { %v1026_v58 = vmax.f32 %v908_v56, 0.0  ;;  %v923_v60 = vadd.f32 %v1791_v57, %v2170_v22  ;;  %v2239_v56 = vld [vmem:[%s2353_s6] ss:$0 sm:$0xff] }
 0x1b6   : > { %v917_v61 = vpop.f32.mrf.mxu1 }
 0x1b7   : > { %v918_v62 = vadd.f32 %v2170_v22, %v917_v61  ;;  %1850 = vmatprep.mubr.msk.f32.mxu0 %vm694_vm1, %v1026_v58  ;;  %v1029_v1 = vmax.f32 %v923_v60, 0.0 }
 0x1b8   : > { %v1794_v63 = vpop.f32.mrf.mxu1  ;;  %1851 = vmatmul.mubr.msk.f32.gmra.mxu0 %vm694_vm1, %v1027_v59 }
 0x1b9   : > { %v1028_v0 = vmax.f32 %v918_v62, 0.0  ;;  %v933_v2 = vadd.f32 %v1794_v63, %v2170_v22 }
 0x1ba   : > { %v927_v3 = vpop.f32.mrf.mxu1 }
 0x1bb   : > { %v928_v4 = vadd.f32 %v2170_v22, %v927_v3  ;;  %1853 = vmatprep.mubr.msk.f32.mxu0 %vm694_vm1, %v1028_v0  ;;  %v1031_v7 = vmax.f32 %v933_v2, 0.0 }
 0x1bc   : > { %v1797_v5 = vpop.f32.mrf.mxu1  ;;  %1854 = vmatmul.mubr.msk.f32.gmra.mxu0 %vm694_vm1, %v1029_v1 }
 0x1bd   : > { %v1030_v6 = vmax.f32 %v928_v4, 0.0  ;;  %v943_v8 = vadd.f32 %v1797_v5, %v2170_v22 }
 0x1be   : > { %v937_v9 = vpop.f32.mrf.mxu1 }
 0x1bf   : > { %v938_v10 = vadd.f32 %v2170_v22, %v937_v9  ;;  %1856 = vmatprep.mubr.msk.f32.mxu0 %vm694_vm1, %v1030_v6  ;;  %v1033_v13 = vmax.f32 %v943_v8, 0.0 }
 0x1c0   : > { %v1800_v11 = vpop.f32.mrf.mxu1  ;;  %1857 = vmatmul.mubr.msk.f32.gmra.mxu0 %vm694_vm1, %v1031_v7 }
 0x1c1   : > { %v1032_v12 = vmax.f32 %v938_v10, 0.0  ;;  %v953_v14 = vadd.f32 %v1800_v11, %v2170_v22 }
 0x1c2   : > { %v947_v15 = vpop.f32.mrf.mxu1 }
 0x1c3   : > { %v948_v16 = vadd.f32 %v2170_v22, %v947_v15  ;;  %1859 = vmatprep.mubr.msk.f32.mxu0 %vm694_vm1, %v1032_v12  ;;  %v1035_v19 = vmax.f32 %v953_v14, 0.0 }
 0x1c4   : > { %v1803_v17 = vpop.f32.mrf.mxu1  ;;  %1860 = vmatmul.mubr.msk.f32.gmra.mxu0 %vm694_vm1, %v1033_v13 }
 0x1c5   : > { %v1034_v18 = vmax.f32 %v948_v16, 0.0  ;;  %v963_v20 = vadd.f32 %v1803_v17, %v2170_v22 }
 0x1c6   : > { %v957_v21 = vpop.f32.mrf.mxu1 }
 0x1c7   : > { %v958_v23 = vadd.f32 %v2170_v22, %v957_v21  ;;  %1862 = vmatprep.mubr.msk.f32.mxu0 %vm694_vm1, %v1034_v18  ;;  %v1037_v25 = vmax.f32 %v963_v20, 0.0 }
 0x1c8   : > { %v1806_v51 = vpop.f32.mrf.mxu1  ;;  %1863 = vmatmul.mubr.msk.f32.gmra.mxu0 %vm694_vm1, %v1035_v19 }
 0x1c9   : > { %v1036_v24 = vmax.f32 %v958_v23, 0.0  ;;  %v973_v26 = vadd.f32 %v1806_v51, %v2170_v22 }
 0x1ca   : > { %v967_v27 = vpop.f32.mrf.mxu1 }
 0x1cb   : > { %v968_v28 = vadd.f32 %v2170_v22, %v967_v27  ;;  %1865 = vmatprep.mubr.msk.f32.mxu0 %vm694_vm1, %v1036_v24  ;;  %v1039_v31 = vmax.f32 %v973_v26, 0.0 }
 0x1cc   : > { %v1809_v29 = vpop.f32.mrf.mxu1  ;;  %1866 = vmatmul.mubr.msk.f32.gmra.mxu0 %vm694_vm1, %v1037_v25 }
 0x1cd   : > { %v1038_v30 = vmax.f32 %v968_v28, 0.0  ;;  %v983_v32 = vadd.f32 %v1809_v29, %v2170_v22 }
 0x1ce   : > { %v977_v33 = vpop.f32.mrf.mxu1 }
 0x1cf   : > { %v978_v34 = vadd.f32 %v2170_v22, %v977_v33  ;;  %1868 = vmatprep.mubr.msk.f32.mxu0 %vm694_vm1, %v1038_v30  ;;  %v1041_v37 = vmax.f32 %v983_v32, 0.0 }
 0x1d0   : > { %v1812_v35 = vpop.f32.mrf.mxu1  ;;  %1869 = vmatmul.mubr.msk.f32.gmra.mxu0 %vm694_vm1, %v1039_v31 }
 0x1d1   : > { %v1040_v36 = vmax.f32 %v978_v34, 0.0  ;;  %v993_v38 = vadd.f32 %v1812_v35, %v2170_v22 }
 0x1d2   : > { %v987_v39 = vpop.f32.mrf.mxu1 }
 0x1d3   : > { %v988_v40 = vadd.f32 %v2170_v22, %v987_v39  ;;  %1871 = vmatprep.mubr.msk.f32.mxu0 %vm694_vm1, %v1040_v36  ;;  %v1043_v43 = vmax.f32 %v993_v38, 0.0 }
 0x1d4   : > { %v1815_v41 = vpop.f32.mrf.mxu1  ;;  %1872 = vmatmul.mubr.msk.f32.gmra.mxu0 %vm694_vm1, %v1041_v37 }
 0x1d5   : > { %v1042_v42 = vmax.f32 %v988_v40, 0.0  ;;  %v1003_v44 = vadd.f32 %v1815_v41, %v2170_v22 }
 0x1d6   : > { %v997_v45 = vpop.f32.mrf.mxu1 }
 0x1d7   : > { %v998_v46 = vadd.f32 %v2170_v22, %v997_v45  ;;  %1874 = vmatprep.mubr.msk.f32.mxu0 %vm694_vm1, %v1042_v42  ;;  %v1045_v49 = vmax.f32 %v1003_v44, 0.0 }
 0x1d8   : > { %v1818_v47 = vpop.f32.mrf.mxu1  ;;  %1875 = vmatmul.mubr.msk.f32.gmra.mxu0 %vm694_vm1, %v1043_v43 }
 0x1d9   : > { %v1044_v48 = vmax.f32 %v998_v46, 0.0  ;;  %v1013_v50 = vadd.f32 %v1818_v47, %v2170_v22 }
 0x1da   : > { %v1007_v52 = vpop.f32.mrf.mxu1 }
 0x1db   : > { %v1008_v53 = vadd.f32 %v2170_v22, %v1007_v52  ;;  %1877 = vmatprep.mubr.msk.f32.mxu0 %vm694_vm1, %v1044_v48  ;;  %v1047_v55 = vmax.f32 %v1013_v50, 0.0 }
 0x1dc   : > { %1878 = vmatmul.mubr.msk.f32.gmra.mxu0 %vm694_vm1, %v1045_v49 }
 0x1dd   : > { %v1046_v54 = vmax.f32 %v1008_v53, 0.0 }
 0x1df   : > { %1880 = vmatprep.mubr.msk.f32.mxu0 %vm694_vm1, %v1046_v54 }
 0x1e0   : > { %1881 = vmatmul.mubr.msk.f32.gmra.mxu0 %vm694_vm1, %v1047_v55 }
 0x264   : > { %v1837_v22 = vpop.f32.mrf.mxu0 }
 0x265   : > { %v1231_v57 = vadd.f32 %v1837_v22, %v2239_v56 }
 0x266   : > { %v1225_v58 = vpop.f32.mrf.mxu0 }
 0x267   : > { %1386 = vst.msk [vmem:[%s2246_s17 + $0x8] sm:$0xff] %vm1384_vm2, %v1231_v57  ;;  %v1226_v59 = vadd.f32 %v2239_v56, %v1225_v58 }
 0x268   : > { %v1840_v60 = vpop.f32.mrf.mxu0 }
 0x269   : > { %1385 = vst.msk [vmem:[%s2246_s17] sm:$0xff] %vm1384_vm2, %v1226_v59  ;;  %v1241_v61 = vadd.f32 %v1840_v60, %v2239_v56 }
 0x26a   : > { %v1235_v62 = vpop.f32.mrf.mxu0 }
 0x26b   : > { %1388 = vst.msk [vmem:[%s2246_s17 + $0x18] sm:$0xff] %vm1384_vm2, %v1241_v61  ;;  %v1236_v63 = vadd.f32 %v2239_v56, %v1235_v62 }
 0x26c   : > { %v1843_v0 = vpop.f32.mrf.mxu0 }
 0x26d   : > { %1387 = vst.msk [vmem:[%s2246_s17 + $0x10] sm:$0xff] %vm1384_vm2, %v1236_v63  ;;  %v1251_v1 = vadd.f32 %v1843_v0, %v2239_v56 }
 0x26e   : > { %v1245_v2 = vpop.f32.mrf.mxu0 }
 0x26f   : > { %1390 = vst.msk [vmem:[%s2246_s17 + $0x28] sm:$0xff] %vm1384_vm2, %v1251_v1  ;;  %v1246_v3 = vadd.f32 %v2239_v56, %v1245_v2 }
 0x270   : > { %v1846_v4 = vpop.f32.mrf.mxu0 }
 0x271   : > { %1389 = vst.msk [vmem:[%s2246_s17 + $0x20] sm:$0xff] %vm1384_vm2, %v1246_v3  ;;  %v1261_v5 = vadd.f32 %v1846_v4, %v2239_v56 }
 0x272   : > { %v1255_v6 = vpop.f32.mrf.mxu0 }
 0x273   : > { %1392 = vst.msk [vmem:[%s2246_s17 + $0x38] sm:$0xff] %vm1384_vm2, %v1261_v5  ;;  %v1256_v7 = vadd.f32 %v2239_v56, %v1255_v6 }
 0x274   : > { %v1849_v8 = vpop.f32.mrf.mxu0 }
 0x275   : > { %1391 = vst.msk [vmem:[%s2246_s17 + $0x30] sm:$0xff] %vm1384_vm2, %v1256_v7  ;;  %v1271_v9 = vadd.f32 %v1849_v8, %v2239_v56 }
 0x276   : > { %v1265_v10 = vpop.f32.mrf.mxu0 }
 0x277   : > { %1394 = vst.msk [vmem:[%s2246_s17 + $0x48] sm:$0xff] %vm1384_vm2, %v1271_v9  ;;  %v1266_v11 = vadd.f32 %v2239_v56, %v1265_v10 }
 0x278   : > { %v1852_v12 = vpop.f32.mrf.mxu0 }
 0x279   : > { %1393 = vst.msk [vmem:[%s2246_s17 + $0x40] sm:$0xff] %vm1384_vm2, %v1266_v11  ;;  %v1281_v13 = vadd.f32 %v1852_v12, %v2239_v56 }
 0x27a   : > { %v1275_v14 = vpop.f32.mrf.mxu0 }
 0x27b   : > { %1396 = vst.msk [vmem:[%s2246_s17 + $0x58] sm:$0xff] %vm1384_vm2, %v1281_v13  ;;  %v1276_v15 = vadd.f32 %v2239_v56, %v1275_v14 }
 0x27c   : > { %v1855_v16 = vpop.f32.mrf.mxu0 }
 0x27d   : > { %1395 = vst.msk [vmem:[%s2246_s17 + $0x50] sm:$0xff] %vm1384_vm2, %v1276_v15  ;;  %v1291_v17 = vadd.f32 %v1855_v16, %v2239_v56 }
 0x27e   : > { %v1285_v18 = vpop.f32.mrf.mxu0 }
 0x27f   : > { %1398 = vst.msk [vmem:[%s2246_s17 + $0x68] sm:$0xff] %vm1384_vm2, %v1291_v17  ;;  %v1286_v19 = vadd.f32 %v2239_v56, %v1285_v18 }
 0x280   : > { %v1858_v20 = vpop.f32.mrf.mxu0 }
 0x281   : > { %1397 = vst.msk [vmem:[%s2246_s17 + $0x60] sm:$0xff] %vm1384_vm2, %v1286_v19  ;;  %v1301_v21 = vadd.f32 %v1858_v20, %v2239_v56 }
 0x282   : > { %v1295_v23 = vpop.f32.mrf.mxu0 }
 0x283   : > { %1400 = vst.msk [vmem:[%s2246_s17 + $0x78] sm:$0xff] %vm1384_vm2, %v1301_v21  ;;  %v1296_v51 = vadd.f32 %v2239_v56, %v1295_v23 }
 0x284   : > { %v1861_v24 = vpop.f32.mrf.mxu0 }
 0x285   : > { %1399 = vst.msk [vmem:[%s2246_s17 + $0x70] sm:$0xff] %vm1384_vm2, %v1296_v51  ;;  %v1311_v25 = vadd.f32 %v1861_v24, %v2239_v56 }
 0x286   : > { %v1305_v26 = vpop.f32.mrf.mxu0 }
 0x287   : > { %1402 = vst.msk [vmem:[%s2246_s17 + $0x88] sm:$0xff] %vm1384_vm2, %v1311_v25  ;;  %v1306_v27 = vadd.f32 %v2239_v56, %v1305_v26 }
 0x288   : > { %v1864_v28 = vpop.f32.mrf.mxu0 }
 0x289   : > { %1401 = vst.msk [vmem:[%s2246_s17 + $0x80] sm:$0xff] %vm1384_vm2, %v1306_v27  ;;  %v1321_v29 = vadd.f32 %v1864_v28, %v2239_v56 }
 0x28a   : > { %v1315_v30 = vpop.f32.mrf.mxu0 }
 0x28b   : > { %1404 = vst.msk [vmem:[%s2246_s17 + $0x98] sm:$0xff] %vm1384_vm2, %v1321_v29  ;;  %v1316_v31 = vadd.f32 %v2239_v56, %v1315_v30 }
 0x28c   : > { %v1867_v32 = vpop.f32.mrf.mxu0 }
 0x28d   : > { %1403 = vst.msk [vmem:[%s2246_s17 + $0x90] sm:$0xff] %vm1384_vm2, %v1316_v31  ;;  %v1331_v33 = vadd.f32 %v1867_v32, %v2239_v56 }
 0x28e   : > { %v1325_v34 = vpop.f32.mrf.mxu0 }
 0x28f   : > { %1406 = vst.msk [vmem:[%s2246_s17 + $0xa8] sm:$0xff] %vm1384_vm2, %v1331_v33  ;;  %v1326_v35 = vadd.f32 %v2239_v56, %v1325_v34 }
 0x290   : > { %v1870_v36 = vpop.f32.mrf.mxu0 }
 0x291   : > { %1405 = vst.msk [vmem:[%s2246_s17 + $0xa0] sm:$0xff] %vm1384_vm2, %v1326_v35  ;;  %v1341_v37 = vadd.f32 %v1870_v36, %v2239_v56 }
 0x292   : > { %v1335_v38 = vpop.f32.mrf.mxu0 }
 0x293   : > { %1408 = vst.msk [vmem:[%s2246_s17 + $0xb8] sm:$0xff] %vm1384_vm2, %v1341_v37  ;;  %v1336_v39 = vadd.f32 %v2239_v56, %v1335_v38 }
 0x294   : > { %v1873_v40 = vpop.f32.mrf.mxu0 }
 0x295   : > { %1407 = vst.msk [vmem:[%s2246_s17 + $0xb0] sm:$0xff] %vm1384_vm2, %v1336_v39  ;;  %v1351_v41 = vadd.f32 %v1873_v40, %v2239_v56 }
 0x296   : > { %v1345_v42 = vpop.f32.mrf.mxu0 }
 0x297   : > { %1410 = vst.msk [vmem:[%s2246_s17 + $0xc8] sm:$0xff] %vm1384_vm2, %v1351_v41  ;;  %v1346_v43 = vadd.f32 %v2239_v56, %v1345_v42 }
 0x298   : > { %v1876_v44 = vpop.f32.mrf.mxu0 }
 0x299   : > { %1409 = vst.msk [vmem:[%s2246_s17 + $0xc0] sm:$0xff] %vm1384_vm2, %v1346_v43  ;;  %v1361_v45 = vadd.f32 %v1876_v44, %v2239_v56 }
 0x29a   : > { %v1355_v46 = vpop.f32.mrf.mxu0 }
 0x29b   : > { %1412 = vst.msk [vmem:[%s2246_s17 + $0xd8] sm:$0xff] %vm1384_vm2, %v1361_v45  ;;  %v1356_v47 = vadd.f32 %v2239_v56, %v1355_v46 }
 0x29c   : > { %v1879_v48 = vpop.f32.mrf.mxu0 }
 0x29d   : > { %1411 = vst.msk [vmem:[%s2246_s17 + $0xd0] sm:$0xff] %vm1384_vm2, %v1356_v47  ;;  %v1371_v49 = vadd.f32 %v1879_v48, %v2239_v56 }
 0x29e   : > { %v1365_v50 = vpop.f32.mrf.mxu0 }
 0x29f   : > { %1414 = vst.msk [vmem:[%s2246_s17 + $0xe8] sm:$0xff] %vm1384_vm2, %v1371_v49  ;;  %v1366_v52 = vadd.f32 %v2239_v56, %v1365_v50 }
 0x2a0   : > { %v1882_v53 = vpop.f32.mrf.mxu0 }
 0x2a1   : > { %1413 = vst.msk [vmem:[%s2246_s17 + $0xe0] sm:$0xff] %vm1384_vm2, %v1366_v52  ;;  %v1381_v54 = vadd.f32 %v1882_v53, %v2239_v56 }
 0x2a2   : > { %v1375_v55 = vpop.f32.mrf.mxu0 }
 0x2a3   : > { %1416 = vst.msk [vmem:[%s2246_s17 + $0xf8] sm:$0xff] %vm1384_vm2, %v1381_v54  ;;  %v1376_v22 = vadd.f32 %v2239_v56, %v1375_v55 }
 0x2a5   : > { %1415 = vst.msk [vmem:[%s2246_s17 + $0xf0] sm:$0xff] %vm1384_vm2, %v1376_v22 }
 0x2a6 PF: > { %s17_s24 = sadd.s32 1, %s1905_s24  }
 0x2a7   : > { %p14_p4 = scmp.ge.s32.totalorder %s17_s24, 4  }
 0x2a9   :  { %16 = sbr.rel (!%p14_p4) target bundleno = 1 (0x1), region = 78 }

</bundles_post_ra>
